<compile_context>
chip_gen: v7x
topology: tpu7x:2x2x1
jax: 0.10.0
libtpu: 0.0.40
codegen_flags: <defaults>
</compile_context>

<pallas_src>
import jax
import jax.numpy as jnp
from jax.experimental import pallas as pl
from jax.experimental.pallas import tpu as pltpu

# SELU constants (match torch.nn.functional.selu)
_SELU_ALPHA = 1.6732632423543772
_SELU_SCALE = 1.0507009873554805

_LANE = 128
_SUBLANE = 8
_MAX_COLS = 2048              # widest lane dim we use (2048 f32 lanes = 8 KiB/row)
_BLOCK_ELEMS = 512 * 1024     # ~2 MiB of f32 per block


def _net_unsupport_kernel(x_ref, o_ref):
    x = x_ref[...]
    s = jnp.sin(x)
    # sinh(s) = (exp(s) - exp(-s)) / 2.  Reuse exp(s); exp(-s) comes from its
    # reciprocal instead of a second exp push (EUP relief, esp. on v7x).
    e = jnp.exp(s)
    sh = 0.5 * (e - pl.reciprocal(e, approx=False))
    # selu(sh) = scale * where(sh > 0, sh, alpha * (exp(sh) - 1))
    # (exp(sh)-1 instead of expm1 keeps the lowering trivially supported; the
    #  absolute error vs expm1 is ~1e-7, far inside the 1e-5 tolerance.)
    neg = _SELU_ALPHA * (jnp.exp(sh) - 1.0)
    out = _SELU_SCALE * jnp.where(sh > 0.0, sh, neg)
    o_ref[...] = out.astype(o_ref.dtype)


def _run_2d(x2d, block_rows):
    rows, cols = x2d.shape
    grid = (rows // block_rows,)
    return pl.pallas_call(
        _net_unsupport_kernel,
        out_shape=jax.ShapeDtypeStruct((rows, cols), x2d.dtype),
        grid_spec=pltpu.PrefetchScalarGridSpec(
            num_scalar_prefetch=0,
            grid=grid,
            in_specs=[pl.BlockSpec((block_rows, cols), lambda i: (i, 0))],
            out_specs=pl.BlockSpec((block_rows, cols), lambda i: (i, 0)),
        ),
        compiler_params=pltpu.CompilerParams(
            dimension_semantics=("parallel",),
        ),
    )(x2d)


def net_unsupport_forward(x):
    """Elementwise selu(sinh(sin(x))) on TPU via Pallas.

    Accepts any shape (e.g. NCHW).  When the element count is a multiple of
    8*128, the input is reshaped (no copy) into a wide lane-dense 2D slab and
    streamed through multi-MiB blocks.  Otherwise a zero-padded fallback is
    used (safe here because selu(sinh(sin(0))) == 0).
    """
    orig_shape = x.shape
    n = x.size

    if n % (_SUBLANE * _LANE) == 0:
        # ---- fast path: pure reshape, no pad / no post-slice copies ----
        # Widen the lane dim as far as it divides n while keeping the row
        # count a multiple of 8 (full sublane packing, unmasked wide stores).
        cols = _LANE
        while (cols * 2 <= _MAX_COLS
               and n % (cols * 2) == 0
               and (n // (cols * 2)) % _SUBLANE == 0):
            cols *= 2
        rows = n // cols  # multiple of 8 by construction

        # Row-block size: grow by powers of two (so it always divides `rows`,
        # never a partial block) until the block is ~2 MiB of f32.  Small
        # inputs (like the shipped 2x4x16x16) end up as one full-array block.
        max_block_rows = max(_SUBLANE, _BLOCK_ELEMS // cols)
        block_rows = _SUBLANE
        while (block_rows * 2 <= max_block_rows
               and rows % (block_rows * 2) == 0):
            block_rows *= 2

        x2d = x.reshape(rows, cols)          # free for contiguous data
        out2d = _run_2d(x2d, block_rows)
        return out2d.reshape(orig_shape)     # free for contiguous data

    # ---- fallback path (never taken for the shipped shape) ----
    # Zero padding is safe only because this activation chain maps 0 -> 0.
    tile_elems = _SUBLANE * _LANE
    n_pad = pl.cdiv(n, tile_elems) * tile_elems
    flat = jnp.pad(jnp.ravel(x), (0, n_pad - n))
    x2d = flat.reshape(n_pad // _LANE, _LANE)
    out2d = _run_2d(x2d, _SUBLANE)
    return out2d.reshape(-1)[:n].reshape(orig_shape)


if __name__ == "__main__":
    key = jax.random.PRNGKey(0)
    # NCHW input, small shapes: batch=2, channels=4, spatial=16x16
    x = jax.random.normal(key, (2, 4, 16, 16), dtype=jnp.float32)

    out = jax.block_until_ready(net_unsupport_forward(x))

    ref = jax.nn.selu(jnp.sinh(jnp.sin(x)))
    assert out.shape == x.shape and out.dtype == x.dtype
    assert jnp.allclose(out, ref, atol=1e-5, rtol=1e-5), "mismatch vs reference"

    print("KERNEL_OK")
</pallas_src>

<mosaic_0001>
module attributes {stable_mosaic.version = 11 : i64} {
  func.func @_net_unsupport_kernel(%arg0: i32, %arg1: memref<8x256xf32, #tpu.memory_space<vmem>>, %arg2: memref<8x256xf32, #tpu.memory_space<vmem>>) attributes {dimension_semantics = [#tpu.dimension_semantics<parallel>], iteration_bounds = array<i64: 1>, scalar_prefetch = 0 : i64, scratch_operands = 0 : i64, tpu.core_type = #tpu.core_type<tc>, window_params = [{transform_indices = @transform_0, window_bounds = array<i64: 8, 256>}, {transform_indices = @transform_1, window_bounds = array<i64: 8, 256>}]} {
    %c0 = arith.constant 0 : index
    %c0_0 = arith.constant 0 : index
    %0 = vector.load %arg1[%c0, %c0_0] : memref<8x256xf32, #tpu.memory_space<vmem>>, vector<8x256xf32>
    %1 = math.sin %0 : vector<8x256xf32>
    %2 = math.exp %1 : vector<8x256xf32>
    %3 = tpu.reciprocal %2 : vector<8x256xf32> -> vector<8x256xf32>
    %4 = arith.subf %2, %3 : vector<8x256xf32>
    %cst = arith.constant 5.000000e-01 : f32
    %5 = vector.broadcast %cst : f32 to vector<8x256xf32>
    %6 = arith.mulf %5, %4 : vector<8x256xf32>
    %7 = math.exp %6 : vector<8x256xf32>
    %cst_1 = arith.constant 1.000000e+00 : f32
    %8 = vector.broadcast %cst_1 : f32 to vector<8x256xf32>
    %9 = arith.subf %7, %8 : vector<8x256xf32>
    %cst_2 = arith.constant 1.67326319 : f32
    %10 = vector.broadcast %cst_2 : f32 to vector<8x256xf32>
    %11 = arith.mulf %10, %9 : vector<8x256xf32>
    %cst_3 = arith.constant 0.000000e+00 : f32
    %12 = vector.broadcast %cst_3 : f32 to vector<8x256xf32>
    %13 = arith.cmpf ogt, %6, %12 : vector<8x256xf32>
    %14 = arith.select %13, %6, %11 : vector<8x256xi1>, vector<8x256xf32>
    %cst_4 = arith.constant 1.05070102 : f32
    %15 = vector.broadcast %cst_4 : f32 to vector<8x256xf32>
    %16 = arith.mulf %15, %14 : vector<8x256xf32>
    %c0_5 = arith.constant 0 : index
    %c0_6 = arith.constant 0 : index
    %17 = vector.load %arg2[%c0_5, %c0_6] : memref<8x256xf32, #tpu.memory_space<vmem>>, vector<8x256xf32>
    tpu.vector_store %arg2[%c0_5, %c0_6], %16 {strides = array<i32>} : memref<8x256xf32, #tpu.memory_space<vmem>>, vector<8x256xf32>,
    return
  }
  func.func @transform_0(%arg0: i32) -> (i32, i32) {
    %c0_i32 = arith.constant 0 : i32
    %c0_i32_0 = arith.constant 0 : i32
    return %arg0, %c0_i32 : i32, i32
  }
  func.func @transform_1(%arg0: i32) -> (i32, i32) {
    %c0_i32 = arith.constant 0 : i32
    %c0_i32_0 = arith.constant 0 : i32
    return %arg0, %c0_i32 : i32, i32
  }
}

</mosaic_0001>

<bundles_post_ra>
// kernel: tpu_custom_call.1
= control target key start
LH: loop header
LB: loop body
LE: loop exit
PB: predicated region body
PF: predicated region fallthrough
CT: control target
= control target key end

     0   :  { %6 = vsyncpa [#allocation3], 0  ;;  %s478_s0 = inlined_call_operand.hbm [shape: f32[8,256], index: 0, kind: input, shape index: {}]   ;;  %s479_s1 = inlined_call_operand.hbm [shape: f32[8,256], index: 1, kind: output, shape index: {}]  }
   0x1   :  { %7 = vsyncpa [#allocation4], 0  ;;  %s366_s6 = smov [#allocation2]   ;;  %s318_s10 = scalar_lea.hbm %s478_s0, 256 }
   0x2   :  { %s14_s7 = sshll.u32 %s366_s6, 4  ;;  %p319_p0 = scmp.ne.s32.totalorder %s478_s0, %s318_s10  ;;  %s15_s7 = int_to_ptr.vmem [resolvable:$true] %s14_s7 }
   0x3   :  { %p322_p1 = scmp.lt.u32.totalorder %s318_s10, %s478_s0 }
   0x5   :  { %p324_p2 = pnand %p322_p1, %p319_p0 }
   0x7   :  { %327 = shalt.err (!%p324_p2)
}
   0x8   :  { %s328_s15 = scalar_lea.vmem %s15_s7, 256  ;;  %p333_p4 = scmp.lt.s32.totalorder %s15_s7, %s15_s7 }
   0x9   :  { %p329_p3 = scmp.ne.s32.totalorder %s15_s7, %s328_s15  ;;  %p334_p5 = scmp.lt.s32.totalorder %s328_s15, %s328_s15 }
   0xb   :  { %p335_p6 = por %p334_p5, %p333_p4 }
   0xd   :  { %p336_p7 = pnand %p335_p6, %p329_p3 }
   0xf   :  { %339 = shalt.err (!%p336_p7)
}
  0x10   :  { %17 = dma.hbm_to_vmem [thread:$0]  %s478_s0, 256, %s15_s7, [#allocation3]  }
  0x11   :  { %362 = dma.done.wait [#allocation3], 256  }
  0x12   :  { %363 = vsyncadd [#allocation3], 4294967040  ;;  %v396_v0 = vld [vmem:[#allocation2] sm:$0xff]  ;;  %v398_v1 = vld [vmem:[#allocation2 + $0x8] sm:$0xff]  ;;  %v367_v24 = vmov 683565275  }
  0x13   :  { %v23_v2 = vand.u32 2147483647, %v396_v0  ;;  %v26_v3 = vand.u32 2139095040, %v396_v0  ;;  %v127_v4 = vand.u32 2147483647, %v398_v1  ;;  %v130_v5 = vand.u32 2139095040, %v398_v1 }
  0x14   :  { %v368_v26 = vmov 2475754826   ;;  %v369_v28 = vmov 2131351028   ;;  %v370_v30 = vmov 2102212464  }
  0x15   :  { %v27_v6 = vshrl.u32 %v26_v3, 23  ;;  %v30_v7 = vand.u32 8388607, %v23_v2  ;;  %v131_v8 = vshrl.u32 %v130_v5, 23  ;;  %v134_v9 = vand.u32 8388607, %v127_v4 }
  0x16   :  { %v371_v32 = vmov 920167782   ;;  %v372_v40 = vmov 1326507024   ;;  %vm25_vm14 = vcmp.lt.s32.totalorder %v396_v0, 0  ;;  %s373_s0 = smov [#allocation5]  }
  0x17   :  { %v272_v10 = vadd.s32 4294967169, %v27_v6  ;;  %v276_v11 = vadd.s32 4294967169, %v131_v8  ;;  %v31_v13 = vor.u32 8388608, %v30_v7  ;;  %v135_v14 = vor.u32 8388608, %v134_v9  ;;  %s263_s18 = sshll.u32 %s373_s0, 4  ;;  %s264_s18 = int_to_ptr.vmem [resolvable:$true] %s263_s18 }
  0x18   :  { %vm24_vm15 = vcmp.le.f32.partialorder %v23_v2, 0.7853982  ;;  %s340_s19 = scalar_lea.vmem %s264_s18, 256  ;;  %p345_p9 = scmp.lt.s32.totalorder %s264_s18, %s264_s18 }
  0x19   :  { %v33_v12 = vadd.s32 1, %v272_v10  ;;  %v137_v15 = vadd.s32 1, %v276_v11  ;;  %v408_v20 = vshll.u32 %v31_v13, 8  ;;  %v410_v22 = vshll.u32 %v135_v14, 8  ;;  %p341_p8 = scmp.ne.s32.totalorder %s264_s18, %s340_s19  ;;  %p346_p10 = scmp.lt.s32.totalorder %s340_s19, %s340_s19 }
  0x1b   :  { %vm34_vm0 = vcmp.gt.s32.totalorder %v33_v12, 0  ;;  %vm138_vm1 = vcmp.gt.s32.totalorder %v137_v15, 0  ;;  %p347_p11 = por %p346_p10, %p345_p9 }
  0x1c   :  { %v35_v16 = vsel %vm34_vm0, %v33_v12, 0  ;;  %v139_v19 = vsel %vm138_vm1, %v137_v15, 0  ;;  %vm129_vm0 = vcmp.lt.s32.totalorder %v398_v1, 0  ;;  %vm128_vm1 = vcmp.le.f32.partialorder %v127_v4, 0.7853982 }
  0x1d   :  { %v36_v17 = vshrl.u32 %v35_v16, 5  ;;  %v37_v18 = vand.u32 31, %v35_v16  ;;  %v141_v21 = vand.u32 31, %v139_v19  ;;  %v412_v34 = vshrl.u32 %v139_v19, 5  ;;  %p348_p12 = pnand %p347_p11, %p341_p8 }
  0x1f   :  { %v38_v23 = vsub.s32 32, %v37_v18  ;;  %v40_v25 = vshll.u32 %v367_v24, %v37_v18  ;;  %v43_v27 = vshll.u32 %v368_v26, %v37_v18  ;;  %v46_v29 = vshll.u32 %v369_v28, %v37_v18 }
  0x20   :  { %v49_v31 = vshll.u32 %v370_v30, %v37_v18  ;;  %v52_v33 = vshll.u32 %v371_v32, %v37_v18  ;;  %vm55_vm2 = vcmp.lt.s32.totalorder %v36_v17, 1  ;;  %vm56_vm3 = vcmp.lt.s32.totalorder %v36_v17, 2 }
  0x21   :  { %v39_v35 = vshrl.u32 %v367_v24, %v38_v23  ;;  %v41_v36 = vshrl.u32 %v368_v26, %v38_v23  ;;  %v44_v37 = vshrl.u32 %v369_v28, %v38_v23  ;;  %v47_v38 = vshrl.u32 %v370_v30, %v38_v23 }
  0x22   :  { %v50_v39 = vshrl.u32 %v371_v32, %v38_v23  ;;  %v53_v41 = vshrl.u32 %v372_v40, %v38_v23  ;;  %vm58_vm4 = vcmp.lt.s32.totalorder %v36_v17, 4  ;;  %v142_v45 = vsub.s32 32, %v141_v21 }
  0x23   :  { %v42_v42 = vor.u32 %v41_v36, %v40_v25  ;;  %v45_v43 = vor.u32 %v44_v37, %v43_v27  ;;  %v48_v44 = vor.u32 %v47_v38, %v46_v29  ;;  %vm57_vm5 = vcmp.lt.s32.totalorder %v36_v17, 3 }
  0x24   :  { %v51_v46 = vor.u32 %v50_v39, %v49_v31  ;;  %v54_v47 = vor.u32 %v53_v41, %v52_v33  ;;  %v144_v48 = vshll.u32 %v367_v24, %v141_v21  ;;  %v147_v56 = vshll.u32 %v368_v26, %v141_v21 }
  0x25   :  { %v59_v49 = vsel %vm55_vm2, %v39_v35, %v42_v42  ;;  %v60_v50 = vsel %vm58_vm4, %v48_v44, 2102212464  ;;  %v63_v51 = vsel %vm55_vm2, %v42_v42, %v45_v43  ;;  %v67_v52 = vsel %vm55_vm2, %v45_v43, %v48_v44 }
  0x26   :  { %v61_v53 = vsel %vm57_vm5, %v45_v43, %v60_v50  ;;  %v64_v54 = vsel %vm58_vm4, %v51_v46, 920167782  ;;  %v68_v55 = vsel %vm58_vm4, %v54_v47, 1326507024  ;;  %v143_v59 = vshrl.u32 %v367_v24, %v142_v45 }
  0x27   :  { %v65_v57 = vsel %vm57_vm5, %v48_v44, %v64_v54  ;;  %v69_v58 = vsel %vm57_vm5, %v51_v46, %v68_v55  ;;  %v145_v60 = vshrl.u32 %v368_v26, %v142_v45  ;;  %v62_v61 = vsel %vm56_vm3, %v59_v49, %v61_v53 }
  0x28   :  { %v66_v62 = vsel %vm56_vm3, %v63_v51, %v65_v57  ;;  %v70_v63 = vsel %vm56_vm3, %v67_v52, %v69_v58  ;;  %v148_v3 = vshrl.u32 %v369_v28, %v142_v45  ;;  %v150_v11 = vshll.u32 %v369_v28, %v141_v21 }
  0x29   :  { %v421_v5 = vmul.u32.u64.low %v408_v20, %v70_v63  ;;  %v422_v6 = vmul.u32.u64.high %v408_v20, %v70_v63, %v421_v5  ;;  %v425_v7 = vmul.u32.u64.low %v408_v20, %v66_v62  ;;  %v426_v8 = vmul.u32.u64.high %v408_v20, %v66_v62, %v425_v7 }
  0x2a   :  { %v146_v9 = vor.u32 %v145_v60, %v144_v48  ;;  %v149_v10 = vor.u32 %v148_v3, %v147_v56  ;;  %v151_v12 = vshrl.u32 %v370_v30, %v142_v45  ;;  %v153_v13 = vshll.u32 %v370_v30, %v141_v21 }
  0x2b   :  { %v154_v14 = vshrl.u32 %v371_v32, %v142_v45  ;;  %v156_v15 = vshll.u32 %v371_v32, %v141_v21  ;;  %v157_v16 = vshrl.u32 %v372_v40, %v142_v45  ;;  %v78_v17 = vmul.u32 %v408_v20, %v62_v61 }
  0x2c   :  { %v152_v18 = vor.u32 %v151_v12, %v150_v11  ;;  %vm159_vm6 = vcmp.lt.s32.totalorder %v412_v34, 1  ;;  %vm160_vm7 = vcmp.lt.s32.totalorder %v412_v34, 2  ;;  %vm80_vm8 = vc.u32 %v422_v6, %v425_v7 }
  0x2d   :  { %v81_v19 = vadd.s32 1, %v426_v8  ;;  %v155_v23 = vor.u32 %v154_v14, %v153_v13  ;;  %vm161_vm9 = vcmp.lt.s32.totalorder %v412_v34, 3  ;;  %v158_v24 = vor.u32 %v157_v16, %v156_v15 }
  0x2e   :  { %vm162_vm10 = vcmp.lt.s32.totalorder %v412_v34, 4  ;;  %v163_v25 = vsel %vm159_vm6, %v143_v59, %v146_v9  ;;  %v167_v21 = vsel %vm159_vm6, %v146_v9, %v149_v10  ;;  %v171_v28 = vsel %vm159_vm6, %v149_v10, %v152_v18 }
  0x2f   :  { %v82_v26 = vsel %vm80_vm8, %v81_v19, %v426_v8  ;;  %v164_v20 = vsel %vm162_vm10, %v152_v18, 2102212464  ;;  %v168_v27 = vsel %vm162_vm10, %v155_v23, 920167782  ;;  %v172_v32 = vsel %vm162_vm10, %v158_v24, 1326507024 }
  0x30   :  { %v83_v29 = vadd.s32 %v82_v26, %v78_v17  ;;  %v165_v30 = vsel %vm161_vm9, %v149_v10, %v164_v20  ;;  %v169_v31 = vsel %vm161_vm9, %v152_v18, %v168_v27  ;;  %v173_v36 = vsel %vm161_vm9, %v155_v23, %v172_v32 }
  0x31   :  { %v166_v33 = vsel %vm160_vm7, %v163_v25, %v165_v30  ;;  %v170_v35 = vsel %vm160_vm7, %v167_v21, %v169_v31  ;;  %v174_v38 = vsel %vm160_vm7, %v171_v28, %v173_v36  ;;  %v79_v57 = vadd.s32 %v425_v7, %v422_v6 }
  0x32   :  { %v84_v37 = vadd.s32 536870912, %v83_v29  ;;  %v443_v39 = vmul.u32.u64.low %v410_v22, %v170_v35  ;;  %v444_v40 = vmul.u32.u64.high %v410_v22, %v170_v35, %v443_v39  ;;  %v182_v44 = vmul.u32 %v410_v22, %v166_v33 }
  0x33   :  { %v447_v41 = vmul.u32.u64.low %v410_v22, %v174_v38  ;;  %v448_v42 = vmul.u32.u64.high %v410_v22, %v174_v38, %v447_v41  ;;  %vm115_vm5 = vweird.f32 %v396_v0  ;;  %vm219_vm9 = vweird.f32 %v398_v1 }
  0x34   :  { %v85_v43 = vshrl.u32 %v84_v37, 30  ;;  %v185_v46 = vadd.s32 1, %v444_v40 }
  0x35   :  { %vm184_vm11 = vc.u32 %v448_v42, %v443_v39  ;;  %v183_v13 = vadd.s32 %v443_v39, %v448_v42 }
  0x36   :  { %v86_v45 = vshll.u32 %v85_v43, 30  ;;  %v186_v34 = vsel %vm184_vm11, %v185_v46, %v444_v40  ;;  %v109_v6 = vsub.s32 4, %v85_v43 }
  0x37   :  { %v187_v48 = vadd.s32 %v186_v34, %v182_v44 }
  0x38   :  { %v87_v47 = vsub.s32 %v83_v29, %v86_v45  ;;  %v110_v25 = vsel %vm25_vm14, %v109_v6, %v85_v43 }
  0x39   :  { %v188_v50 = vadd.s32 536870912, %v187_v48  ;;  %v112_v28 = vsel %vm24_vm15, 0, %v110_v25 }
  0x3a   :  { %v89_v49 = vsub.s32 0, %v87_v47  ;;  %v116_v33 = vadd.s32 3, %v112_v28 }
  0x3b   :  { %v189_v52 = vshrl.u32 %v188_v50, 30 }
  0x3c   :  { %v273_v51 = vmin.u32 %v89_v49, %v87_v47  ;;  %v117_v37 = vand.u32 3, %v116_v33 }
  0x3d   :  { %v190_v54 = vshll.u32 %v189_v52, 30  ;;  %v213_v32 = vsub.s32 4, %v189_v52 }
  0x3e   :  { %v91_v53 = vclz %v273_v51  ;;  %vm122_vm2 = vcmp.eq.s32.totalorder %v117_v37, 2  ;;  %vm119_vm3 = vcmp.eq.s32.totalorder %v117_v37, 0  ;;  %vm118_vm4 = vcmp.lt.s32.totalorder %v117_v37, 2 }
  0x3f   :  { %v191_v56 = vsub.s32 %v187_v48, %v190_v54  ;;  %v214_v36 = vsel %vm129_vm0, %v213_v32, %v189_v52 }
  0x40   :  { %v274_v55 = vadd.s32 4294967294, %v91_v53  ;;  %v216_v40 = vsel %vm128_vm1, 0, %v214_v36 }
  0x41   :  { %v193_v58 = vsub.s32 0, %v191_v56  ;;  %v220_v44 = vadd.s32 3, %v216_v40 }
  0x42   :  { %vm275_vm12 = vcmp.lt.s32.totalorder %v274_v55, 0 }
  0x43   :  { %v94_v22 = vsel %vm275_vm12, 0, %v274_v55  ;;  %v277_v62 = vmin.u32 %v193_v58, %v191_v56  ;;  %v221_v34 = vand.u32 3, %v220_v44 }
  0x44   :  { %v95_v59 = vsub.s32 32, %v94_v22  ;;  %v96_v60 = vshll.u32 %v87_v47, %v94_v22  ;;  %v99_v61 = vsub.s32 4294967266, %v94_v22 }
  0x45   :  { %v195_v5 = vclz %v277_v62  ;;  %vm226_vm6 = vcmp.eq.s32.totalorder %v221_v34, 2  ;;  %vm223_vm7 = vcmp.eq.s32.totalorder %v221_v34, 0  ;;  %vm222_vm8 = vcmp.lt.s32.totalorder %v221_v34, 2 }
  0x46   :  { %v97_v63 = vshrl.u32 %v79_v57, %v95_v59  ;;  %v100_v3 = vadd.s32 127, %v99_v61 }
  0x47   :  { %v278_v10 = vadd.s32 4294967294, %v195_v5 }
  0x48   :  { %v98_v8 = vor.u32 %v97_v63, %v96_v60  ;;  %v101_v9 = vshll.u32 %v100_v3, 23 }
  0x49   :  { %vm279_vm13 = vcmp.lt.s32.totalorder %v278_v10, 0 }
  0x4a   :  { %v102_v11 = vor.u32 4788187, %v101_v9  ;;  %v105_v12 = vcvt.s32.f32 %v98_v8  ;;  %v198_v7 = vsel %vm279_vm13, 0, %v278_v10 }
  0x4b   :  { %v199_v15 = vsub.s32 32, %v198_v7  ;;  %v200_v16 = vshll.u32 %v191_v56, %v198_v7  ;;  %v203_v17 = vsub.s32 4294967266, %v198_v7 }
  0x4c   :  { %v103_v14 = vand.u32 2147483647, %v102_v11 }
  0x4d   :  { %v201_v19 = vshrl.u32 %v183_v13, %v199_v15  ;;  %v204_v23 = vadd.s32 127, %v203_v17 }
  0x4e   :  { %v106_v18 = vmul.f32 %v105_v12, %v103_v14 }
  0x4f   :  { %v202_v21 = vor.u32 %v201_v19, %v200_v16  ;;  %v205_v26 = vshll.u32 %v204_v23, 23 }
  0x50   :  { %v107_v24 = vxor.u32 2147483648, %v106_v18 }
  0x51   :  { %v206_v29 = vor.u32 4788187, %v205_v26  ;;  %v209_v30 = vcvt.s32.f32 %v202_v21 }
  0x52   :  { %v108_v20 = vsel %vm25_vm14, %v107_v24, %v106_v18 }
  0x53   :  { %v111_v27 = vsel %vm24_vm15, %v396_v0, %v108_v20  ;;  %v207_v31 = vand.u32 2147483647, %v206_v29 }
  0x54   :  { %298 = vcosq.f32 %v111_v27 }
  0x55   :  { %300 = vsinq.f32 %v111_v27  ;;  %v210_v35 = vmul.f32 %v209_v30, %v207_v31 }
  0x57   :  { %v211_v2 = vxor.u32 2147483648, %v210_v35 }
  0x59   :  { %v212_v38 = vsel %vm129_vm0, %v211_v2, %v210_v35 }
  0x5a   :  { %v215_v39 = vsel %vm128_vm1, %v398_v1, %v212_v38 }
  0x5b   :  { %302 = vcosq.f32 %v215_v39 }
  0x5c   :  { %304 = vsinq.f32 %v215_v39 }
  0x5e   :  { %v299_v41 = vpop.eup %298 }
  0x5f   :  { %v301_v42 = vpop.eup %300  ;;  %v123_v43 = vxor.u32 2147483648, %v299_v41 }
  0x60   :  { %v120_v45 = vxor.u32 2147483648, %v301_v42 }
  0x61   :  { %v124_v4 = vsel %vm122_vm2, %v123_v43, %v301_v42 }
  0x62   :  { %v121_v46 = vsel %vm119_vm3, %v299_v41, %v120_v45 }
  0x63   :  { %v125_v47 = vsel %vm118_vm4, %v121_v46, %v124_v4 }
  0x64   :  { %v126_v48 = vsel %vm115_vm5, nan, %v125_v47 }
  0x65   :  { %v231_v49 = vmul.f32 1.442695, %v126_v48  ;;  %v303_v50 = vpop.eup %302 }
  0x66   :  { %v305_v51 = vpop.eup %304  ;;  %v227_v52 = vxor.u32 2147483648, %v303_v50 }
  0x67   :  { %306 = vpow2.f32 %v231_v49  ;;  %v224_v53 = vxor.u32 2147483648, %v305_v51 }
  0x68   :  { %v228_v54 = vsel %vm226_vm6, %v227_v52, %v305_v51 }
  0x69   :  { %v225_v55 = vsel %vm223_vm7, %v303_v50, %v224_v53 }
  0x6a   :  { %v229_v56 = vsel %vm222_vm8, %v225_v55, %v228_v54 }
  0x6b   :  { %v230_v0 = vsel %vm219_vm9, nan, %v229_v56 }
  0x6c   :  { %v233_v57 = vmul.f32 1.442695, %v230_v0 }
  0x6e   :  { %308 = vpow2.f32 %v233_v57 }
  0x71   :  { %v307_v22 = vpop.eup %306 }
  0x72   :  { %310 = vrcp.f32 %v307_v22 }
  0x78   :  { %v309_v58 = vpop.eup %308 }
  0x79   :  { %312 = vrcp.f32 %v309_v58 }
  0x7c   :  { %v311_v59 = vpop.eup %310 }
  0x7d   :  { %v237_v60 = vsub.f32 %v307_v22, %v311_v59 }
  0x7f   :  { %v239_v61 = vmul.f32 0.5, %v237_v60 }
  0x81   :  { %v241_v62 = vmul.f32 1.442695, %v239_v61  ;;  %vm249_vm10 = vcmp.gt.f32.partialorder %v239_v61, 0.0 }
  0x83   :  { %314 = vpow2.f32 %v241_v62  ;;  %v313_v63 = vpop.eup %312 }
  0x84   :  { %v238_v3 = vsub.f32 %v309_v58, %v313_v63 }
  0x86   :  { %v240_v5 = vmul.f32 0.5, %v238_v3 }
  0x88   :  { %v243_v8 = vmul.f32 1.442695, %v240_v5  ;;  %vm250_vm11 = vcmp.gt.f32.partialorder %v240_v5, 0.0 }
  0x8a   :  { %316 = vpow2.f32 %v243_v8 }
  0x8d   :  { %v315_v1 = vpop.eup %314 }
  0x8e   :  { %v280_v9 = vadd.f32 -1.0, %v315_v1 }
  0x90   :  { %v247_v10 = vmul.f32 1.6732632, %v280_v9 }
  0x92   :  { %v251_v11 = vsel %vm249_vm10, %v239_v61, %v247_v10 }
  0x93   :  { %v253_v12 = vmul.f32 1.050701, %v251_v11 }
  0x94   :  { %v317_v13 = vpop.eup %316 }
  0x95   :  { %255 = vst [vmem:[#allocation5] sm:$0xff] %v253_v12  ;;  %v281_v14 = vadd.f32 -1.0, %v317_v13 }
  0x97   :  { %v248_v6 = vmul.f32 1.6732632, %v281_v14 }
  0x99   :  { %v252_v7 = vsel %vm250_vm11, %v240_v5, %v248_v6 }
  0x9a   :  { %v254_v15 = vmul.f32 1.050701, %v252_v7 }
  0x9c   :  { %256 = vst [vmem:[#allocation5 + $0x8] sm:$0xff] %v254_v15 }
  0x9d   :  { %351 = shalt.err (!%p348_p12)
}
  0x9e   :  { %s352_s22 = scalar_lea.hbm %s479_s1, 256 }
  0x9f   :  { %p353_p13 = scmp.ne.s32.totalorder %s479_s1, %s352_s22  ;;  %p356_p0 = scmp.lt.u32.totalorder %s352_s22, %s479_s1 }
  0xa1   :  { %p358_p1 = pnand %p356_p0, %p353_p13 }
  0xa3   :  { %361 = shalt.err (!%p358_p1)
}
  0xa4   :  { %266 = dma.vmem_to_hbm [thread:$0]  %s264_s18, 256, %s479_s1, [#allocation4]  }
  0xa5   :  { %364 = dma.done.wait [#allocation4], 256  }
  0xa6   :  { %365 = vsyncadd [#allocation4], 4294967040 }
  0xa7   :  { %270 = vsyncpa [#allocation3], 1 }
  0xa8   :  { %271 = vsyncpa [#allocation4], 1 }

</bundles_post_ra>
